<compile_context>
chip_gen: v5e
topology: v5e:2x2
jax: 0.10.0
libtpu: 0.0.40
codegen_flags: <defaults>
</compile_context>

<pallas_src>
import functools

import jax
import jax.numpy as jnp
from jax.experimental import pallas as pl
from jax.experimental.pallas import tpu as pltpu


def _round_up(x, m):
    return ((x + m - 1) // m) * m


def _bn_relu_conv1x1_kernel(x_ref, scale_ref, shift_ref, w_ref, o_ref,
                            *, use_mxu, cin):
    # x_ref:     (Cin, TM)        channels in sublanes, spatial in lanes
    # scale_ref: (Cin, 1)         BN scale  (gamma / sqrt(var + eps))
    # shift_ref: (Cin, 1)         BN shift  (beta - mean * scale)
    # w_ref:     (Cout, Cin)      if use_mxu  (MXU path)
    #            (Cin, Cout, 1)   otherwise   (VPU path)
    # o_ref:     (Cout, TM)       lane-dense output tile
    h = jnp.maximum(x_ref[...] * scale_ref[...] + shift_ref[...], 0.0)  # (Cin, TM)
    if use_mxu:
        o_ref[...] = jnp.dot(
            w_ref[...], h, preferred_element_type=jnp.float32
        ).astype(o_ref.dtype)
    else:
        # Tiny contraction (e.g. 4 -> 8): Cout x Cin broadcast-FMAs on the VPU,
        # no MXU push/pop latency.  Static unrolled loop over Cin.
        acc = w_ref[0] * h[0:1, :]                 # (Cout,1)*(1,TM) -> (Cout,TM)
        for k in range(1, cin):
            acc = acc + w_ref[k] * h[k:k + 1, :]
        o_ref[...] = acc.astype(o_ref.dtype)


def conv3d_block_forward(x, gamma, beta, conv_w, *, eps=1e-5, tm=4096):
    """Forward of Conv3d_Block(num_in, num_out, k=1, s=1, g=1, norm='bn').

    x:      (N, Cin, D, H, W)  float32   (PyTorch NCDHW layout)
    gamma:  (Cin,)   BN weight
    beta:   (Cin,)   BN bias
    conv_w: (Cout, Cin, 1, 1, 1)  Conv3d weight (bias=False)
    returns (N, Cout, D, H, W)
    """
    N, Cin, D, H, W = x.shape
    Cout = conv_w.shape[0]
    assert conv_w.shape[1] == Cin and conv_w.shape[2:] == (1, 1, 1), \
        "only the 1x1x1 / groups=1 path is implemented"

    # --- BatchNorm3d (training mode): stats over (N, D, H, W) per channel ---
    mean = jnp.mean(x, axis=(0, 2, 3, 4))          # (Cin,)
    var = jnp.var(x, axis=(0, 2, 3, 4))            # biased var, numerically stable
    scale = gamma / jnp.sqrt(var + eps)            # (Cin,)
    shift = beta - mean * scale                    # (Cin,)

    # --- keep NCDHW; fold spatial dims only (free reshape, no transpose) ---
    M = D * H * W
    x3 = x.reshape(N, Cin, M)                      # (N, Cin, M)

    # Spatial (lane) tile: multiple of 128, padded tail if needed.
    block_m = min(tm, _round_up(M, 128))
    block_m = _round_up(block_m, 128)
    M_pad = _round_up(M, block_m)
    if M_pad != M:
        x3 = jnp.pad(x3, ((0, 0), (0, 0), (0, M_pad - M)))

    scale2 = scale.reshape(Cin, 1)
    shift2 = shift.reshape(Cin, 1)

    # Pick contraction path from static channel counts.
    use_mxu = (Cin >= 32 and Cout >= 32)
    if use_mxu:
        w_arg = conv_w.reshape(Cout, Cin)                       # (Cout, Cin)
        w_spec = pl.BlockSpec((Cout, Cin), lambda n, i: (0, 0))
    else:
        w_arg = conv_w.reshape(Cout, Cin).T.reshape(Cin, Cout, 1)   # (Cin, Cout, 1)
        w_spec = pl.BlockSpec((Cin, Cout, 1), lambda n, i: (0, 0, 0))

    grid = (N, M_pad // block_m)

    # Rough VMEM budget (double-buffered in/out tiles + resident params);
    # raise the scoped limit only when large tiles need it (keeps v7x's 64 MiB
    # physical VMEM comfortable at default settings otherwise).
    est_bytes = (2 * (Cin + Cout) * block_m + Cout * Cin + 2 * Cin) * 4
    cp_kwargs = dict(dimension_semantics=("parallel", "parallel"))
    if est_bytes > 24 * 1024 * 1024:
        cp_kwargs["vmem_limit_bytes"] = int(min(2 * est_bytes, 60 * 1024 * 1024))

    kernel = functools.partial(_bn_relu_conv1x1_kernel,
                               use_mxu=use_mxu, cin=Cin)

    out3 = pl.pallas_call(
        kernel,
        out_shape=jax.ShapeDtypeStruct((N, Cout, M_pad), x.dtype),
        grid_spec=pltpu.PrefetchScalarGridSpec(
            num_scalar_prefetch=0,
            grid=grid,
            in_specs=[
                pl.BlockSpec((None, Cin, block_m), lambda n, i: (n, 0, i)),
                pl.BlockSpec((Cin, 1), lambda n, i: (0, 0)),
                pl.BlockSpec((Cin, 1), lambda n, i: (0, 0)),
                w_spec,
            ],
            out_specs=pl.BlockSpec((None, Cout, block_m), lambda n, i: (n, 0, i)),
        ),
        compiler_params=pltpu.CompilerParams(**cp_kwargs),
    )(x3, scale2, shift2, w_arg)

    # Drop spatial padding (no-op slice when M_pad == M) and restore NCDHW.
    out = out3[:, :, :M].reshape(N, Cout, D, H, W)
    return out


def _reference_forward(x, gamma, beta, conv_w, eps=1e-5):
    mean = jnp.mean(x, axis=(0, 2, 3, 4), keepdims=True)
    var = jnp.var(x, axis=(0, 2, 3, 4), keepdims=True)
    h = (x - mean) / jnp.sqrt(var + eps)
    h = h * gamma.reshape(1, -1, 1, 1, 1) + beta.reshape(1, -1, 1, 1, 1)
    h = jnp.maximum(h, 0.0)
    w = conv_w.reshape(conv_w.shape[0], conv_w.shape[1])   # (Cout, Cin)
    return jnp.einsum("ncdhw,oc->nodhw", h, w)


if __name__ == "__main__":
    key = jax.random.PRNGKey(0)
    k1, k2, k3, k4 = jax.random.split(key, 4)

    N, Cin, Cout, D, H, W = 2, 4, 8, 8, 8, 8   # M = 8*8*8 = 512
    x = jax.random.normal(k1, (N, Cin, D, H, W), dtype=jnp.float32)
    gamma = 1.0 + 0.1 * jax.random.normal(k2, (Cin,), dtype=jnp.float32)
    beta = 0.1 * jax.random.normal(k3, (Cin,), dtype=jnp.float32)
    conv_w = 0.2 * jax.random.normal(k4, (Cout, Cin, 1, 1, 1), dtype=jnp.float32)

    fwd = jax.jit(functools.partial(conv3d_block_forward, tm=4096))
    out = fwd(x, gamma, beta, conv_w)
    out = jax.block_until_ready(out)

    ref = _reference_forward(x, gamma, beta, conv_w)
    assert out.shape == (N, Cout, D, H, W)
    assert jnp.allclose(out, ref, atol=1e-4, rtol=1e-4), "mismatch vs reference"

    print("KERNEL_OK")
</pallas_src>

<mosaic_0001>
module attributes {stable_mosaic.version = 11 : i64} {
  func.func @_bn_relu_conv1x1_kernel(%arg0: i32, %arg1: i32, %arg2: memref<1x4x512xf32, #tpu.memory_space<vmem>>, %arg3: memref<4x1xf32, #tpu.memory_space<vmem>>, %arg4: memref<4x1xf32, #tpu.memory_space<vmem>>, %arg5: memref<4x8x1xf32, #tpu.memory_space<vmem>>, %arg6: memref<1x8x512xf32, #tpu.memory_space<vmem>>) attributes {dimension_semantics = [#tpu.dimension_semantics<parallel>, #tpu.dimension_semantics<parallel>], iteration_bounds = array<i64: 2, 1>, scalar_prefetch = 0 : i64, scratch_operands = 0 : i64, tpu.core_type = #tpu.core_type<tc>, window_params = [{transform_indices = @transform_0, window_bounds = array<i64: 1, 4, 512>}, {pipeline_mode = #tpu.pipeline_mode<synchronous>, transform_indices = @transform_1, window_bounds = array<i64: 4, 1>}, {pipeline_mode = #tpu.pipeline_mode<synchronous>, transform_indices = @transform_2, window_bounds = array<i64: 4, 1>}, {pipeline_mode = #tpu.pipeline_mode<synchronous>, transform_indices = @transform_3, window_bounds = array<i64: 4, 8, 1>}, {transform_indices = @transform_4, window_bounds = array<i64: 1, 8, 512>}]} {
    %c0 = arith.constant 0 : index
    %c0_0 = arith.constant 0 : index
    %c0_1 = arith.constant 0 : index
    %0 = vector.load %arg2[%c0, %c0_0, %c0_1] : memref<1x4x512xf32, #tpu.memory_space<vmem>>, vector<1x4x512xf32>
    %1 = vector.shape_cast %0 : vector<1x4x512xf32> to vector<4x512xf32>
    %c0_2 = arith.constant 0 : index
    %c0_3 = arith.constant 0 : index
    %2 = vector.load %arg3[%c0_2, %c0_3] : memref<4x1xf32, #tpu.memory_space<vmem>>, vector<4x1xf32>
    %3 = vector.broadcast %2 : vector<4x1xf32> to vector<4x512xf32>
    %4 = arith.mulf %1, %3 : vector<4x512xf32>
    %c0_4 = arith.constant 0 : index
    %c0_5 = arith.constant 0 : index
    %5 = vector.load %arg4[%c0_4, %c0_5] : memref<4x1xf32, #tpu.memory_space<vmem>>, vector<4x1xf32>
    %6 = vector.broadcast %5 : vector<4x1xf32> to vector<4x512xf32>
    %7 = arith.addf %4, %6 : vector<4x512xf32>
    %cst = arith.constant 0.000000e+00 : f32
    %8 = vector.broadcast %cst : f32 to vector<4x512xf32>
    %9 = arith.maximumf %7, %8 : vector<4x512xf32>
    %c0_6 = arith.constant 0 : index
    %c0_7 = arith.constant 0 : index
    %c0_8 = arith.constant 0 : index
    %10 = vector.load %arg5[%c0_6, %c0_7, %c0_8] : memref<4x8x1xf32, #tpu.memory_space<vmem>>, vector<1x8x1xf32>
    %11 = vector.shape_cast %10 : vector<1x8x1xf32> to vector<8x1xf32>
    %12 = vector.extract_strided_slice %9 {offsets = [0, 0], sizes = [1, 512], strides = [1, 1]} : vector<4x512xf32> to vector<1x512xf32>
    %13 = vector.broadcast %11 : vector<8x1xf32> to vector<8x512xf32>
    %14 = vector.broadcast %12 : vector<1x512xf32> to vector<8x512xf32>
    %15 = arith.mulf %13, %14 : vector<8x512xf32>
    %c1 = arith.constant 1 : index
    %c0_9 = arith.constant 0 : index
    %c0_10 = arith.constant 0 : index
    %16 = vector.load %arg5[%c1, %c0_9, %c0_10] : memref<4x8x1xf32, #tpu.memory_space<vmem>>, vector<1x8x1xf32>
    %17 = vector.shape_cast %16 : vector<1x8x1xf32> to vector<8x1xf32>
    %18 = vector.extract_strided_slice %9 {offsets = [1, 0], sizes = [1, 512], strides = [1, 1]} : vector<4x512xf32> to vector<1x512xf32>
    %19 = vector.broadcast %17 : vector<8x1xf32> to vector<8x512xf32>
    %20 = vector.broadcast %18 : vector<1x512xf32> to vector<8x512xf32>
    %21 = arith.mulf %19, %20 : vector<8x512xf32>
    %22 = arith.addf %15, %21 : vector<8x512xf32>
    %c2 = arith.constant 2 : index
    %c0_11 = arith.constant 0 : index
    %c0_12 = arith.constant 0 : index
    %23 = vector.load %arg5[%c2, %c0_11, %c0_12] : memref<4x8x1xf32, #tpu.memory_space<vmem>>, vector<1x8x1xf32>
    %24 = vector.shape_cast %23 : vector<1x8x1xf32> to vector<8x1xf32>
    %25 = vector.extract_strided_slice %9 {offsets = [2, 0], sizes = [1, 512], strides = [1, 1]} : vector<4x512xf32> to vector<1x512xf32>
    %26 = vector.broadcast %24 : vector<8x1xf32> to vector<8x512xf32>
    %27 = vector.broadcast %25 : vector<1x512xf32> to vector<8x512xf32>
    %28 = arith.mulf %26, %27 : vector<8x512xf32>
    %29 = arith.addf %22, %28 : vector<8x512xf32>
    %c3 = arith.constant 3 : index
    %c0_13 = arith.constant 0 : index
    %c0_14 = arith.constant 0 : index
    %30 = vector.load %arg5[%c3, %c0_13, %c0_14] : memref<4x8x1xf32, #tpu.memory_space<vmem>>, vector<1x8x1xf32>
    %31 = vector.shape_cast %30 : vector<1x8x1xf32> to vector<8x1xf32>
    %32 = vector.extract_strided_slice %9 {offsets = [3, 0], sizes = [1, 512], strides = [1, 1]} : vector<4x512xf32> to vector<1x512xf32>
    %33 = vector.broadcast %31 : vector<8x1xf32> to vector<8x512xf32>
    %34 = vector.broadcast %32 : vector<1x512xf32> to vector<8x512xf32>
    %35 = arith.mulf %33, %34 : vector<8x512xf32>
    %36 = arith.addf %29, %35 : vector<8x512xf32>
    %c0_15 = arith.constant 0 : index
    %c0_16 = arith.constant 0 : index
    %c0_17 = arith.constant 0 : index
    %37 = vector.load %arg6[%c0_15, %c0_16, %c0_17] : memref<1x8x512xf32, #tpu.memory_space<vmem>>, vector<1x8x512xf32>
    %38 = vector.shape_cast %37 : vector<1x8x512xf32> to vector<8x512xf32>
    %39 = vector.shape_cast %36 : vector<8x512xf32> to vector<1x8x512xf32>
    tpu.vector_store %arg6[%c0_15, %c0_16, %c0_17], %39 {strides = array<i32>} : memref<1x8x512xf32, #tpu.memory_space<vmem>>, vector<1x8x512xf32>,
    return
  }
  func.func @transform_0(%arg0: i32, %arg1: i32) -> (i32, i32, i32) {
    %c0_i32 = arith.constant 0 : i32
    %c0_i32_0 = arith.constant 0 : i32
    return %arg0, %c0_i32, %arg1 : i32, i32, i32
  }
  func.func @transform_1(%arg0: i32, %arg1: i32) -> (i32, i32) {
    %c0_i32 = arith.constant 0 : i32
    %c0_i32_0 = arith.constant 0 : i32
    %c0_i32_1 = arith.constant 0 : i32
    return %c0_i32, %c0_i32_0 : i32, i32
  }
  func.func @transform_2(%arg0: i32, %arg1: i32) -> (i32, i32) {
    %c0_i32 = arith.constant 0 : i32
    %c0_i32_0 = arith.constant 0 : i32
    %c0_i32_1 = arith.constant 0 : i32
    return %c0_i32, %c0_i32_0 : i32, i32
  }
  func.func @transform_3(%arg0: i32, %arg1: i32) -> (i32, i32, i32) {
    %c0_i32 = arith.constant 0 : i32
    %c0_i32_0 = arith.constant 0 : i32
    %c0_i32_1 = arith.constant 0 : i32
    %c0_i32_2 = arith.constant 0 : i32
    return %c0_i32, %c0_i32_0, %c0_i32_1 : i32, i32, i32
  }
  func.func @transform_4(%arg0: i32, %arg1: i32) -> (i32, i32, i32) {
    %c0_i32 = arith.constant 0 : i32
    %c0_i32_0 = arith.constant 0 : i32
    return %arg0, %c0_i32, %arg1 : i32, i32, i32
  }
}

</mosaic_0001>

<bundles_post_ra>
// kernel: conv3d_block_forward.1
= control target key start
LH: loop header
LB: loop body
LE: loop exit
PB: predicated region body
PF: predicated region fallthrough
CT: control target
= control target key end

     0   :  { %s557_s15 = smov 0   ;;  %s559_s16 = smov 0   ;;  %s612_s0 = inlined_call_operand.vmem [shape: f32[2,4,512], index: 0, kind: input, shape index: {}]   ;;  %s613_s1 = inlined_call_operand.vmem [shape: f32[4,1], index: 1, kind: input, shape index: {}]   ;;  %s614_s2 = inlined_call_operand.vmem [shape: f32[4,1], index: 2, kind: input, shape index: {}]   ;;  %s615_s3 = inlined_call_operand.vmem [shape: f32[4,8,1], index: 3, kind: input, shape index: {}]   ;;  %s616_s4 = inlined_call_operand.vmem [shape: f32[2,8,512], index: 4, kind: output, shape index: {}]  }
   0x1   :  { %s561_s17 = smov 0  }
   0x2 LB: > { %s26_s18 = sadd.s32 1, %s524_s16  ;;  %p465_p0 = scmp.ge.s32.totalorder %s528_s17, 1  ;;  %s528_s17 = sphi %s561_s17, %s14_s17   ;;  %s524_s16 = sphi %s559_s16, %s618_s16   ;;  %s520_s15 = sphi %s557_s15, %s617_s15  }
   0x3   : > { %p28_p1 = scmp.ge.s32.totalorder %s26_s18, 2  ;;  %p183_p2 = scmp.lt.s32.totalorder %s528_s17, 3 }
   0x5   : > { %s620_s18 = smov (%p28_p1, %s26_s18), 0  ;;  %p184_p3 = pnand %p465_p0, %p183_p2 }
   0x6   : > { %p218_p4 = scmp.lt.s32.totalorder (!%p184_p3), %s520_s15, 1 }
   0x7   : > { %187 = sbr.rel (%p184_p3) target bundleno = 164 (0xa4), region = 36 }
   0xc   : > { %v239_v0 = vld [vmem:[%s613_s1] sm:$0xf]  ;;  %v530_v2 = vmov 0   ;;  %v471_v3 = vld [vmem:[%s615_s3 + $0x10] sm:$0xff]  ;;  %v470_v5 = vld [vmem:[%s615_s3 + $0x8] sm:$0xff]  ;;  %s622_s15 = smov (!%p218_p4, %s520_s15), 1 }
   0xd   : > { %v265_v1 = vld [vmem:[%s615_s3] sm:$0xff]  ;;  %503 = vset.pattern.permute.xlu0 %v530_v2  ;;  %504 = vset.pattern.permute.xlu1 %v530_v2  ;;  %v472_v6 = vld [vmem:[%s615_s3 + $0x18] sm:$0xff]  ;;  %v531_v7 = vmov 839922192   ;;  %s475_s5 = sshll.u32 %s622_s15, 4  ;;  %s476_s9 = sshll.u32 %s622_s15, 5 }
   0xe   : > { %242 = vperm.xlu0 %503, %v239_v0   ;;  %268 = vperm.xlu1 %504, %v265_v1   ;;  %v251_v4 = vld [vmem:[%s614_s2] sm:$0xf]  ;;  %v245_v8 = vunpack.c.l.s4 %v531_v7  ;;  %s225_s8 = scalar_lea.vmem %s612_s0, %s475_s5  ;;  %s235_s12 = scalar_lea.vmem %s616_s4, %s476_s9 }
   0xf   : > { %505 = vset.pattern.permute.xlu2 %v530_v2  ;;  %v237_v12 = vld [vmem:[%s225_s8] sm:$0xff]  ;;  %v238_v13 = vld [vmem:[%s225_s8 + $0x8] sm:$0xff] }
  0x10   : > { %320 = vperm.xlu2 %505, %v471_v3   ;;  %v246_v10 = vunpack.c.0.s8 %v245_v8 }
  0x16   : > { %254 = vperm.xlu0 %503, %v251_v4   ;;  %293 = vperm.xlu1 %504, %v470_v5  }
  0x18   : > { %347 = vperm.xlu2 %505, %v472_v6  }
  0x6a   : > { %v321_v31 = vpop.permute.xlu2 %320 }
  0x80   : > { %v243_v9 = vpop.permute.xlu0 %242  ;;  %v269_v17 = vpop.permute.xlu1 %268 }
  0x81   : > { %v247_v11 = vperm.slane %v243_v9, %v246_v10  ;;  %v348_v9 = vpop.permute.xlu2 %347 }
  0x83   : > { %v249_v15 = vmul.f32 %v247_v11, %v237_v12  ;;  %v250_v16 = vmul.f32 %v247_v11, %v238_v13 }
  0x88   : > { %v255_v14 = vpop.permute.xlu0 %254  ;;  %v294_v40 = vpop.permute.xlu1 %293 }
  0x89   : > { %v259_v18 = vperm.slane %v255_v14, %v246_v10 }
  0x8b   : > { %v261_v19 = vadd.f32 %v259_v18, %v249_v15  ;;  %v262_v20 = vadd.f32 %v259_v18, %v250_v16 }
  0x8d   : > { %v263_v21 = vmax.f32 %v261_v19, 0.0  ;;  %v264_v22 = vmax.f32 %v262_v20, 0.0 }
  0x8f   : > { %v273_v23 = vperm.slane %v263_v21, 0  ;;  %v274_v24 = vperm.slane %v263_v21, 4  ;;  %v275_v25 = vperm.slane %v264_v22, 0  ;;  %v276_v26 = vperm.slane %v264_v22, 4 }
  0x90   : > { %v296_v27 = vperm.slane %v263_v21, 1  ;;  %v297_v28 = vperm.slane %v263_v21, 5  ;;  %v298_v29 = vperm.slane %v264_v22, 1  ;;  %v299_v30 = vperm.slane %v264_v22, 5 }
  0x91   : > { %v281_v32 = vperm.slane %v273_v23, 0  ;;  %v282_v33 = vperm.slane %v274_v24, 0  ;;  %v283_v34 = vperm.slane %v275_v25, 0  ;;  %v284_v35 = vperm.slane %v276_v26, 0 }
  0x92   : > { %v304_v36 = vperm.slane %v296_v27, 1  ;;  %v305_v37 = vperm.slane %v297_v28, 1  ;;  %v306_v38 = vperm.slane %v298_v29, 1  ;;  %v307_v39 = vperm.slane %v299_v30, 1 }
  0x93   : > { %v285_v41 = vmul.f32 %v281_v32, %v269_v17  ;;  %v286_v42 = vmul.f32 %v282_v33, %v269_v17  ;;  %v287_v43 = vmul.f32 %v283_v34, %v269_v17  ;;  %v288_v44 = vmul.f32 %v284_v35, %v269_v17 }
  0x94   : > { %v308_v45 = vmul.f32 %v304_v36, %v294_v40  ;;  %v309_v46 = vmul.f32 %v305_v37, %v294_v40  ;;  %v310_v47 = vmul.f32 %v306_v38, %v294_v40  ;;  %v311_v48 = vmul.f32 %v307_v39, %v294_v40 }
  0x95   : > { %v323_v49 = vperm.slane %v263_v21, 2  ;;  %v324_v50 = vperm.slane %v263_v21, 6  ;;  %v325_v51 = vperm.slane %v264_v22, 2  ;;  %v326_v52 = vperm.slane %v264_v22, 6 }
  0x96   : > { %v312_v53 = vadd.f32 %v308_v45, %v285_v41  ;;  %v313_v54 = vadd.f32 %v309_v46, %v286_v42  ;;  %v314_v55 = vadd.f32 %v310_v47, %v287_v43  ;;  %v315_v56 = vadd.f32 %v311_v48, %v288_v44 }
  0x97   : > { %v331_v57 = vperm.slane %v323_v49, 2  ;;  %v332_v58 = vperm.slane %v324_v50, 2  ;;  %v333_v59 = vperm.slane %v325_v51, 2  ;;  %v334_v60 = vperm.slane %v326_v52, 2 }
  0x98   : > { %v350_v61 = vperm.slane %v263_v21, 3  ;;  %v351_v62 = vperm.slane %v263_v21, 7  ;;  %v352_v63 = vperm.slane %v264_v22, 3  ;;  %v353_v0 = vperm.slane %v264_v22, 7 }
  0x99   : > { %v335_v1 = vmul.f32 %v331_v57, %v321_v31  ;;  %v336_v2 = vmul.f32 %v332_v58, %v321_v31  ;;  %v337_v3 = vmul.f32 %v333_v59, %v321_v31  ;;  %v338_v4 = vmul.f32 %v334_v60, %v321_v31 }
  0x9a   : > { %v358_v5 = vperm.slane %v350_v61, 3  ;;  %v359_v6 = vperm.slane %v351_v62, 3  ;;  %v360_v7 = vperm.slane %v352_v63, 3  ;;  %v361_v8 = vperm.slane %v353_v0, 3 }
  0x9b   : > { %v339_v10 = vadd.f32 %v335_v1, %v312_v53  ;;  %v340_v11 = vadd.f32 %v336_v2, %v313_v54  ;;  %v341_v12 = vadd.f32 %v337_v3, %v314_v55  ;;  %v342_v13 = vadd.f32 %v338_v4, %v315_v56 }
  0x9c   : > { %v362_v14 = vmul.f32 %v358_v5, %v348_v9  ;;  %v363_v15 = vmul.f32 %v359_v6, %v348_v9  ;;  %v364_v16 = vmul.f32 %v360_v7, %v348_v9  ;;  %v365_v17 = vmul.f32 %v361_v8, %v348_v9 }
  0x9e   : > { %v366_v18 = vadd.f32 %v362_v14, %v339_v10  ;;  %v367_v19 = vadd.f32 %v363_v15, %v340_v11  ;;  %v368_v20 = vadd.f32 %v364_v16, %v341_v12  ;;  %v369_v21 = vadd.f32 %v365_v17, %v342_v13 }
  0xa0   : > { %370 = vst [vmem:[%s235_s12] sm:$0xff] %v366_v18 }
  0xa1   : > { %371 = vst [vmem:[%s235_s12 + $0x8] sm:$0xff] %v367_v19 }
  0xa2   : > { %372 = vst [vmem:[%s235_s12 + $0x10] sm:$0xff] %v368_v20 }
  0xa3   : > { %373 = vst [vmem:[%s235_s12 + $0x18] sm:$0xff] %v369_v21 }
  0xa4 PF: > { %s14_s17 = sadd.s32 1, %s528_s17   ;;  %s617_s15 = smov %s524_s16 }
  0xa5   : > { %p11_p5 = scmp.ge.s32.totalorder %s14_s17, 4   ;;  %s618_s16 = smov %s620_s18 }
  0xa7   :  { %13 = sbr.rel (!%p11_p5) target bundleno = 2 (0x2), region = 69 }

</bundles_post_ra>
